<compile_context>
chip_gen: v7x
topology: tpu7x:2x2x1
jax: 0.10.0
libtpu: 0.0.40
codegen_flags: <defaults>
</compile_context>

<pallas_src>
import jax
import jax.numpy as jnp
from jax.experimental import pallas as pl
from jax.experimental.pallas import tpu as pltpu


def _round_up(x, m):
    return (x + m - 1) // m * m


def _choose_tt(T_out, N, C_in, C_out, K, in_itemsize, out_itemsize, budget_bytes):
    """Largest time tile Tt (divides T_out, (Tt*N)%8==0) fitting the VMEM budget."""
    lane_in = _round_up(max(C_in, 1), 128)     # VMEM lane padding of the input scratch
    lane_out = _round_up(max(C_out, 1), 128)   # VMEM lane padding of f32 temps / out blocks
    for d in range(T_out, 0, -1):
        if T_out % d != 0 or (d * N) % 8 != 0:
            continue
        rows_in = (d + K - 1) * N
        rows_out = d * N
        footprint = (2 * rows_in * lane_in * in_itemsize          # double-buffered input window
                     + 2 * rows_out * lane_out * out_itemsize     # double-buffered output block
                     + 5 * rows_out * lane_out * 4                # p/q/r f32 accumulators + temps
                     + 2 * 3 * K * _round_up(C_in, 8) * lane_out * in_itemsize)  # weights
        if footprint <= budget_bytes:
            return d
    raise NotImplementedError(
        "temporal_conv: no time tile with (Tt*N) % 8 == 0 fits the VMEM budget "
        f"(T_out={T_out}, N={N}, budget={budget_bytes} bytes).")


def _build_kernel(T, Tt, n_jt, N, C_in, C_out, K):
    rows_out = Tt * N                 # output rows produced per grid step
    rows_in = (Tt + K - 1) * N        # overlapping input window fetched per grid step
    multi = n_jt > 1

    def kernel(x_hbm, w_ref, b_ref, o_ref, buf, sem):
        b = pl.program_id(0)
        jt = pl.program_id(1)
        slot = (jt % 2) if multi else 0

        def start_fetch(jt_target, dst_slot):
            row0 = (b * T + jt_target * Tt) * N
            pltpu.make_async_copy(
                x_hbm.at[pl.ds(row0, rows_in)],
                buf.at[dst_slot],
                sem.at[dst_slot],
            ).start()

        # First tile of this batch entry fetches its own window: no DMA carry
        # across the "parallel" batch axis -> megacore-safe on v7x.
        @pl.when(jt == 0)
        def _():
            start_fetch(0, 0)

        if multi:
            # Prefetch the next time tile of the same batch entry (overlaps with
            # this step's compute + output writeback).
            @pl.when(jt + 1 < n_jt)
            def _():
                start_fetch(jt + 1, 1 - slot)

        # Wait for the current window.
        cur_row0 = (b * T + jt * Tt) * N
        pltpu.make_async_copy(
            x_hbm.at[pl.ds(cur_row0, rows_in)],
            buf.at[slot],
            sem.at[slot],
        ).wait()

        cur = buf.at[slot]
        p = jnp.zeros((rows_out, C_out), jnp.float32)
        q = jnp.zeros((rows_out, C_out), jnp.float32)
        r = jnp.zeros((rows_out, C_out), jnp.float32)
        for k in range(K):                          # K is small; static unrolled
            xk = cur[pl.ds(k * N, rows_out), :]     # temporal tap = static row shift
            p = p + jnp.dot(xk, w_ref[0, k], preferred_element_type=jnp.float32)
            q = q + jnp.dot(xk, w_ref[1, k], preferred_element_type=jnp.float32)
            r = r + jnp.dot(xk, w_ref[2, k], preferred_element_type=jnp.float32)
        p = p + b_ref[0]
        q = q + b_ref[1]
        r = r + b_ref[2]
        # sigmoid -> EUP, add/max -> VPU; all on the f32 accumulators.
        out = jnp.maximum(p + jax.nn.sigmoid(q) + r, 0.0)
        o_ref[...] = out.astype(o_ref.dtype)

    return kernel, rows_out, rows_in


def temporal_conv(X, w1, b1, w2, b2, w3, b3, *, compute_dtype=None,
                  vmem_budget_bytes=24 * 1024 * 1024,
                  vmem_limit_bytes=32 * 1024 * 1024):
    """X: (B, T, N, C_in); w_i: (C_out, C_in, 1, K); b_i: (C_out,)."""
    B, T, N, C_in = X.shape
    C_out, c_in_w, kh, K = w1.shape
    assert c_in_w == C_in and kh == 1, "weights must be (C_out, C_in, 1, K)"
    assert T >= K, "kernel_size must be <= input_time_steps"
    T_out = T - (K - 1)
    M = B * T_out * N
    out_dtype = X.dtype

    # ---- weights (3, K, C_in, C_out) and bias (3, 1, C_out) ----
    W = jnp.stack([w1, w2, w3], axis=0)                   # (3, C_out, C_in, 1, K)
    W = jnp.transpose(W[:, :, :, 0, :], (0, 3, 2, 1))     # (3, K, C_in, C_out)
    Bias = jnp.stack([b1, b2, b3], axis=0).reshape(3, 1, C_out).astype(jnp.float32)

    x_dtype = jnp.dtype(compute_dtype) if compute_dtype is not None else X.dtype
    Xf = X.reshape(B * T * N, C_in)                       # pure view, no HBM copy
    if Xf.dtype != x_dtype:
        Xf = Xf.astype(x_dtype)
    if W.dtype != x_dtype:
        W = W.astype(x_dtype)

    in_itemsize = jnp.dtype(x_dtype).itemsize
    out_itemsize = jnp.dtype(out_dtype).itemsize
    Tt = _choose_tt(T_out, N, C_in, C_out, K, in_itemsize, out_itemsize,
                    vmem_budget_bytes)
    n_jt = T_out // Tt
    kernel, rows_out, rows_in = _build_kernel(T, Tt, n_jt, N, C_in, C_out, K)
    n_buf = 2 if n_jt > 1 else 1

    flops = 2 * M * C_in * K * 3 * C_out + 6 * M * C_out
    bytes_accessed = (Xf.size * in_itemsize + W.size * in_itemsize
                      + Bias.size * 4 + M * C_out * out_itemsize)
    cost = pl.CostEstimate(flops=flops, transcendentals=M * C_out,
                           bytes_accessed=bytes_accessed)

    out_flat = pl.pallas_call(
        kernel,
        out_shape=jax.ShapeDtypeStruct((M, C_out), out_dtype),
        grid_spec=pltpu.PrefetchScalarGridSpec(
            num_scalar_prefetch=0,
            grid=(B, n_jt),
            in_specs=[
                pl.BlockSpec(memory_space=pl.ANY),                       # X stays in HBM
                pl.BlockSpec((3, K, C_in, C_out), lambda b, jt: (0, 0, 0, 0)),
                pl.BlockSpec((3, 1, C_out), lambda b, jt: (0, 0, 0)),
            ],
            out_specs=pl.BlockSpec((rows_out, C_out),
                                   lambda b, jt: (b * n_jt + jt, 0)),
            scratch_shapes=[
                pltpu.VMEM((n_buf, rows_in, C_in), x_dtype),             # input window buffers
                pltpu.SemaphoreType.DMA((n_buf,)),
            ],
        ),
        compiler_params=pltpu.CompilerParams(
            dimension_semantics=("parallel", "arbitrary"),
            vmem_limit_bytes=vmem_limit_bytes,
        ),
        cost_estimate=cost,
    )(Xf, W, Bias)

    return out_flat.reshape(B, T_out, N, C_out)            # free view, no slice pass


def _reference(X, w1, b1, w2, b2, w3, b3):
    """Pure-JAX reference mirroring the PyTorch forward."""
    B, T, N, C_in = X.shape
    C_out, _, _, K = w1.shape
    T_out = T - (K - 1)
    shifts = jnp.stack([X[:, k:k + T_out] for k in range(K)], axis=-1)  # (B,T_out,N,C_in,K)

    def conv(w, b):
        return jnp.einsum('btnck,ock->btno', shifts, w[:, :, 0, :]) + b

    P = conv(w1, b1)
    Q = jax.nn.sigmoid(conv(w2, b2))
    return jnp.maximum(P + Q + conv(w3, b3), 0.0)


if __name__ == "__main__":
    key = jax.random.PRNGKey(0)
    B, T, N, C_in, C_out, K = 2, 8, 16, 4, 32, 3    # T_out = 6

    ks = jax.random.split(key, 7)
    X = jax.random.normal(ks[0], (B, T, N, C_in), dtype=jnp.float32)
    fan_in = C_in * K
    scale = 1.0 / (fan_in ** 0.5)
    w1 = jax.random.uniform(ks[1], (C_out, C_in, 1, K), jnp.float32, -scale, scale)
    w2 = jax.random.uniform(ks[2], (C_out, C_in, 1, K), jnp.float32, -scale, scale)
    w3 = jax.random.uniform(ks[3], (C_out, C_in, 1, K), jnp.float32, -scale, scale)
    b1 = jax.random.uniform(ks[4], (C_out,), jnp.float32, -scale, scale)
    b2 = jax.random.uniform(ks[5], (C_out,), jnp.float32, -scale, scale)
    b3 = jax.random.uniform(ks[6], (C_out,), jnp.float32, -scale, scale)

    ref = _reference(X, w1, b1, w2, b2, w3, b3)

    # f32 path: exact semantics.
    out = temporal_conv(X, w1, b1, w2, b2, w3, b3)
    out = jax.block_until_ready(out)
    assert out.shape == (B, T - K + 1, N, C_out)
    assert jnp.allclose(out, ref, atol=1e-5, rtol=1e-5), "f32 mismatch vs reference"

    # bf16-streaming path (feedback): same kernel, bf16 inputs/weights, f32 accumulation.
    out_bf = temporal_conv(X.astype(jnp.bfloat16), w1, b1, w2, b2, w3, b3,
                           compute_dtype=jnp.bfloat16)
    out_bf = jax.block_until_ready(out_bf)
    assert out_bf.shape == ref.shape
    assert jnp.allclose(out_bf.astype(jnp.float32), ref, atol=2e-1, rtol=2e-1), \
        "bf16 mismatch vs reference"

    print("KERNEL_OK")
</pallas_src>

<mosaic_0001>
module attributes {stable_mosaic.version = 11 : i64} {
  func.func @kernel(%arg0: i32, %arg1: i32, %arg2: memref<256x4xf32, #tpu.memory_space<any>>, %arg3: memref<3x3x4x32xf32, #tpu.memory_space<vmem>>, %arg4: memref<3x1x32xf32, #tpu.memory_space<vmem>>, %arg5: memref<96x32xf32, #tpu.memory_space<vmem>>, %arg6: memref<1x128x4xf32, #tpu.memory_space<vmem>>, %arg7: memref<1x!tpu.dma_semaphore, #tpu.memory_space<semaphore_mem>>) attributes {dimension_semantics = [#tpu.dimension_semantics<parallel>, #tpu.dimension_semantics<arbitrary>], iteration_bounds = array<i64: 2, 1>, scalar_prefetch = 0 : i64, scratch_operands = 2 : i64, tpu.core_type = #tpu.core_type<tc>, window_params = [{}, {pipeline_mode = #tpu.pipeline_mode<synchronous>, transform_indices = @transform_1, window_bounds = array<i64: 3, 3, 4, 32>}, {pipeline_mode = #tpu.pipeline_mode<synchronous>, transform_indices = @transform_2, window_bounds = array<i64: 3, 1, 32>}, {transform_indices = @transform_3, window_bounds = array<i64: 96, 32>}]} {
    %c0_i32 = arith.constant 0 : i32
    %0 = arith.cmpi eq, %arg1, %c0_i32 : i32
    %1 = arith.extui %0 : i1 to i32
    %c0_i32_0 = arith.constant 0 : i32
    %2 = arith.cmpi ne, %1, %c0_i32_0 : i32
    scf.if %2 {
      %c8_i32_76 = arith.constant 8 : i32
      %82 = arith.muli %arg0, %c8_i32_76 : i32
      %c0_i32_77 = arith.constant 0 : i32
      %83 = arith.addi %82, %c0_i32_77 : i32
      %c16_i32_78 = arith.constant 16 : i32
      %84 = arith.muli %83, %c16_i32_78 : i32
      %c0_i32_79 = arith.constant 0 : i32
      %c0_i32_80 = arith.constant 0 : i32
      %c0_i32_81 = arith.constant 0 : i32
      %85 = tpu.memref_slice %arg2[%84, %c0_i32_81] : memref<256x4xf32, #tpu.memory_space<any>> -> memref<128x4xf32, #tpu.memory_space<any>>
      %c0_i32_82 = arith.constant 0 : i32
      %c0_i32_83 = arith.constant 0 : i32
      %86 = tpu.memref_slice %arg6[%c0_i32_79, %c0_i32_82, %c0_i32_83] : memref<1x128x4xf32, #tpu.memory_space<vmem>> -> memref<1x128x4xf32, #tpu.memory_space<vmem>>
      %87 = tpu.memref_squeeze %86 : memref<1x128x4xf32, #tpu.memory_space<vmem>> -> memref<128x4xf32, #tpu.memory_space<vmem>>
      %88 = tpu.memref_slice %arg7[%c0_i32_80] : memref<1x!tpu.dma_semaphore, #tpu.memory_space<semaphore_mem>> -> memref<1x!tpu.dma_semaphore, #tpu.memory_space<semaphore_mem>>
      %89 = tpu.memref_squeeze %88 : memref<1x!tpu.dma_semaphore, #tpu.memory_space<semaphore_mem>> -> memref<!tpu.dma_semaphore, #tpu.memory_space<semaphore_mem>>
      tpu.enqueue_dma source(%85 : memref<128x4xf32, #tpu.memory_space<any>>) target(%87 : memref<128x4xf32, #tpu.memory_space<vmem>>) target_semaphore(%89 : memref<!tpu.dma_semaphore, #tpu.memory_space<semaphore_mem>>)
    } else {
    }
    %c8_i32 = arith.constant 8 : i32
    %3 = arith.muli %arg0, %c8_i32 : i32
    %c6_i32 = arith.constant 6 : i32
    %4 = arith.muli %arg1, %c6_i32 : i32
    %5 = arith.addi %3, %4 : i32
    %c16_i32 = arith.constant 16 : i32
    %6 = arith.muli %5, %c16_i32 : i32
    %c0_i32_1 = arith.constant 0 : i32
    %c0_i32_2 = arith.constant 0 : i32
    %c0_i32_3 = arith.constant 0 : i32
    %7 = tpu.memref_slice %arg2[%6, %c0_i32_3] : memref<256x4xf32, #tpu.memory_space<any>> -> memref<128x4xf32, #tpu.memory_space<any>>
    %c0_i32_4 = arith.constant 0 : i32
    %c0_i32_5 = arith.constant 0 : i32
    %8 = tpu.memref_slice %arg6[%c0_i32_1, %c0_i32_4, %c0_i32_5] : memref<1x128x4xf32, #tpu.memory_space<vmem>> -> memref<1x128x4xf32, #tpu.memory_space<vmem>>
    %9 = tpu.memref_squeeze %8 : memref<1x128x4xf32, #tpu.memory_space<vmem>> -> memref<128x4xf32, #tpu.memory_space<vmem>>
    %10 = tpu.memref_slice %arg7[%c0_i32_2] : memref<1x!tpu.dma_semaphore, #tpu.memory_space<semaphore_mem>> -> memref<1x!tpu.dma_semaphore, #tpu.memory_space<semaphore_mem>>
    %11 = tpu.memref_squeeze %10 : memref<1x!tpu.dma_semaphore, #tpu.memory_space<semaphore_mem>> -> memref<!tpu.dma_semaphore, #tpu.memory_space<semaphore_mem>>
    tpu.wait_dma2 semaphore(%11 : memref<!tpu.dma_semaphore, #tpu.memory_space<semaphore_mem>>) src(%7 : memref<128x4xf32, #tpu.memory_space<any>>) dst(%9 : memref<128x4xf32, #tpu.memory_space<vmem>>)
    %cst = arith.constant 0.000000e+00 : f32
    %12 = vector.broadcast %cst : f32 to vector<96x32xf32>
    %cst_6 = arith.constant 0.000000e+00 : f32
    %13 = vector.broadcast %cst_6 : f32 to vector<96x32xf32>
    %cst_7 = arith.constant 0.000000e+00 : f32
    %14 = vector.broadcast %cst_7 : f32 to vector<96x32xf32>
    %c0_i32_8 = arith.constant 0 : i32
    %c0_i32_9 = arith.constant 0 : i32
    %c0_i32_10 = arith.constant 0 : i32
    %15 = tpu.memref_slice %arg6[%c0_i32_8, %c0_i32_9, %c0_i32_10] : memref<1x128x4xf32, #tpu.memory_space<vmem>> -> memref<1x128x4xf32, #tpu.memory_space<vmem>>
    %16 = tpu.memref_squeeze %15 : memref<1x128x4xf32, #tpu.memory_space<vmem>> -> memref<128x4xf32, #tpu.memory_space<vmem>>
    %c0 = arith.constant 0 : index
    %c0_11 = arith.constant 0 : index
    %17 = vector.load %16[%c0, %c0_11] : memref<128x4xf32, #tpu.memory_space<vmem>>, vector<96x4xf32>
    %c0_12 = arith.constant 0 : index
    %c0_13 = arith.constant 0 : index
    %c0_14 = arith.constant 0 : index
    %c0_15 = arith.constant 0 : index
    %18 = vector.load %arg3[%c0_12, %c0_13, %c0_14, %c0_15] : memref<3x3x4x32xf32, #tpu.memory_space<vmem>>, vector<1x1x4x32xf32>
    %19 = vector.shape_cast %18 : vector<1x1x4x32xf32> to vector<4x32xf32>
    %cst_16 = arith.constant dense<0.000000e+00> : vector<96x32xf32>
    %20 = tpu.matmul %17, %19, %cst_16 {dimension_numbers = #tpu.dot_dimension_numbers<[1], [0], [0], [1], [0, 0, 1, 1], [], []>} : vector<96x4xf32>, vector<4x32xf32>, vector<96x32xf32> -> vector<96x32xf32>
    %21 = arith.addf %12, %20 : vector<96x32xf32>
    %c1 = arith.constant 1 : index
    %c0_17 = arith.constant 0 : index
    %c0_18 = arith.constant 0 : index
    %c0_19 = arith.constant 0 : index
    %22 = vector.load %arg3[%c1, %c0_17, %c0_18, %c0_19] : memref<3x3x4x32xf32, #tpu.memory_space<vmem>>, vector<1x1x4x32xf32>
    %23 = vector.shape_cast %22 : vector<1x1x4x32xf32> to vector<4x32xf32>
    %cst_20 = arith.constant dense<0.000000e+00> : vector<96x32xf32>
    %24 = tpu.matmul %17, %23, %cst_20 {dimension_numbers = #tpu.dot_dimension_numbers<[1], [0], [0], [1], [0, 0, 1, 1], [], []>} : vector<96x4xf32>, vector<4x32xf32>, vector<96x32xf32> -> vector<96x32xf32>
    %25 = arith.addf %13, %24 : vector<96x32xf32>
    %c2 = arith.constant 2 : index
    %c0_21 = arith.constant 0 : index
    %c0_22 = arith.constant 0 : index
    %c0_23 = arith.constant 0 : index
    %26 = vector.load %arg3[%c2, %c0_21, %c0_22, %c0_23] : memref<3x3x4x32xf32, #tpu.memory_space<vmem>>, vector<1x1x4x32xf32>
    %27 = vector.shape_cast %26 : vector<1x1x4x32xf32> to vector<4x32xf32>
    %cst_24 = arith.constant dense<0.000000e+00> : vector<96x32xf32>
    %28 = tpu.matmul %17, %27, %cst_24 {dimension_numbers = #tpu.dot_dimension_numbers<[1], [0], [0], [1], [0, 0, 1, 1], [], []>} : vector<96x4xf32>, vector<4x32xf32>, vector<96x32xf32> -> vector<96x32xf32>
    %29 = arith.addf %14, %28 : vector<96x32xf32>
    %c0_i32_25 = arith.constant 0 : i32
    %c0_i32_26 = arith.constant 0 : i32
    %c0_i32_27 = arith.constant 0 : i32
    %30 = tpu.memref_slice %arg6[%c0_i32_25, %c0_i32_26, %c0_i32_27] : memref<1x128x4xf32, #tpu.memory_space<vmem>> -> memref<1x128x4xf32, #tpu.memory_space<vmem>>
    %31 = tpu.memref_squeeze %30 : memref<1x128x4xf32, #tpu.memory_space<vmem>> -> memref<128x4xf32, #tpu.memory_space<vmem>>
    %c16 = arith.constant 16 : index
    %c0_28 = arith.constant 0 : index
    %32 = vector.load %31[%c16, %c0_28] : memref<128x4xf32, #tpu.memory_space<vmem>>, vector<96x4xf32>
    %c0_29 = arith.constant 0 : index
    %c1_30 = arith.constant 1 : index
    %c0_31 = arith.constant 0 : index
    %c0_32 = arith.constant 0 : index
    %33 = vector.load %arg3[%c0_29, %c1_30, %c0_31, %c0_32] : memref<3x3x4x32xf32, #tpu.memory_space<vmem>>, vector<1x1x4x32xf32>
    %34 = vector.shape_cast %33 : vector<1x1x4x32xf32> to vector<4x32xf32>
    %cst_33 = arith.constant dense<0.000000e+00> : vector<96x32xf32>
    %35 = tpu.matmul %32, %34, %cst_33 {dimension_numbers = #tpu.dot_dimension_numbers<[1], [0], [0], [1], [0, 0, 1, 1], [], []>} : vector<96x4xf32>, vector<4x32xf32>, vector<96x32xf32> -> vector<96x32xf32>
    %36 = arith.addf %21, %35 : vector<96x32xf32>
    %c1_34 = arith.constant 1 : index
    %c1_35 = arith.constant 1 : index
    %c0_36 = arith.constant 0 : index
    %c0_37 = arith.constant 0 : index
    %37 = vector.load %arg3[%c1_34, %c1_35, %c0_36, %c0_37] : memref<3x3x4x32xf32, #tpu.memory_space<vmem>>, vector<1x1x4x32xf32>
    %38 = vector.shape_cast %37 : vector<1x1x4x32xf32> to vector<4x32xf32>
    %cst_38 = arith.constant dense<0.000000e+00> : vector<96x32xf32>
    %39 = tpu.matmul %32, %38, %cst_38 {dimension_numbers = #tpu.dot_dimension_numbers<[1], [0], [0], [1], [0, 0, 1, 1], [], []>} : vector<96x4xf32>, vector<4x32xf32>, vector<96x32xf32> -> vector<96x32xf32>
    %40 = arith.addf %25, %39 : vector<96x32xf32>
    %c2_39 = arith.constant 2 : index
    %c1_40 = arith.constant 1 : index
    %c0_41 = arith.constant 0 : index
    %c0_42 = arith.constant 0 : index
    %41 = vector.load %arg3[%c2_39, %c1_40, %c0_41, %c0_42] : memref<3x3x4x32xf32, #tpu.memory_space<vmem>>, vector<1x1x4x32xf32>
    %42 = vector.shape_cast %41 : vector<1x1x4x32xf32> to vector<4x32xf32>
    %cst_43 = arith.constant dense<0.000000e+00> : vector<96x32xf32>
    %43 = tpu.matmul %32, %42, %cst_43 {dimension_numbers = #tpu.dot_dimension_numbers<[1], [0], [0], [1], [0, 0, 1, 1], [], []>} : vector<96x4xf32>, vector<4x32xf32>, vector<96x32xf32> -> vector<96x32xf32>
    %44 = arith.addf %29, %43 : vector<96x32xf32>
    %c0_i32_44 = arith.constant 0 : i32
    %c0_i32_45 = arith.constant 0 : i32
    %c0_i32_46 = arith.constant 0 : i32
    %45 = tpu.memref_slice %arg6[%c0_i32_44, %c0_i32_45, %c0_i32_46] : memref<1x128x4xf32, #tpu.memory_space<vmem>> -> memref<1x128x4xf32, #tpu.memory_space<vmem>>
    %46 = tpu.memref_squeeze %45 : memref<1x128x4xf32, #tpu.memory_space<vmem>> -> memref<128x4xf32, #tpu.memory_space<vmem>>
    %c32 = arith.constant 32 : index
    %c0_47 = arith.constant 0 : index
    %47 = vector.load %46[%c32, %c0_47] : memref<128x4xf32, #tpu.memory_space<vmem>>, vector<96x4xf32>
    %c0_48 = arith.constant 0 : index
    %c2_49 = arith.constant 2 : index
    %c0_50 = arith.constant 0 : index
    %c0_51 = arith.constant 0 : index
    %48 = vector.load %arg3[%c0_48, %c2_49, %c0_50, %c0_51] : memref<3x3x4x32xf32, #tpu.memory_space<vmem>>, vector<1x1x4x32xf32>
    %49 = vector.shape_cast %48 : vector<1x1x4x32xf32> to vector<4x32xf32>
    %cst_52 = arith.constant dense<0.000000e+00> : vector<96x32xf32>
    %50 = tpu.matmul %47, %49, %cst_52 {dimension_numbers = #tpu.dot_dimension_numbers<[1], [0], [0], [1], [0, 0, 1, 1], [], []>} : vector<96x4xf32>, vector<4x32xf32>, vector<96x32xf32> -> vector<96x32xf32>
    %51 = arith.addf %36, %50 : vector<96x32xf32>
    %c1_53 = arith.constant 1 : index
    %c2_54 = arith.constant 2 : index
    %c0_55 = arith.constant 0 : index
    %c0_56 = arith.constant 0 : index
    %52 = vector.load %arg3[%c1_53, %c2_54, %c0_55, %c0_56] : memref<3x3x4x32xf32, #tpu.memory_space<vmem>>, vector<1x1x4x32xf32>
    %53 = vector.shape_cast %52 : vector<1x1x4x32xf32> to vector<4x32xf32>
    %cst_57 = arith.constant dense<0.000000e+00> : vector<96x32xf32>
    %54 = tpu.matmul %47, %53, %cst_57 {dimension_numbers = #tpu.dot_dimension_numbers<[1], [0], [0], [1], [0, 0, 1, 1], [], []>} : vector<96x4xf32>, vector<4x32xf32>, vector<96x32xf32> -> vector<96x32xf32>
    %55 = arith.addf %40, %54 : vector<96x32xf32>
    %c2_58 = arith.constant 2 : index
    %c2_59 = arith.constant 2 : index
    %c0_60 = arith.constant 0 : index
    %c0_61 = arith.constant 0 : index
    %56 = vector.load %arg3[%c2_58, %c2_59, %c0_60, %c0_61] : memref<3x3x4x32xf32, #tpu.memory_space<vmem>>, vector<1x1x4x32xf32>
    %57 = vector.shape_cast %56 : vector<1x1x4x32xf32> to vector<4x32xf32>
    %cst_62 = arith.constant dense<0.000000e+00> : vector<96x32xf32>
    %58 = tpu.matmul %47, %57, %cst_62 {dimension_numbers = #tpu.dot_dimension_numbers<[1], [0], [0], [1], [0, 0, 1, 1], [], []>} : vector<96x4xf32>, vector<4x32xf32>, vector<96x32xf32> -> vector<96x32xf32>
    %59 = arith.addf %44, %58 : vector<96x32xf32>
    %c0_63 = arith.constant 0 : index
    %c0_64 = arith.constant 0 : index
    %c0_65 = arith.constant 0 : index
    %60 = vector.load %arg4[%c0_63, %c0_64, %c0_65] : memref<3x1x32xf32, #tpu.memory_space<vmem>>, vector<1x1x32xf32>
    %61 = vector.shape_cast %60 : vector<1x1x32xf32> to vector<1x32xf32>
    %62 = vector.broadcast %61 : vector<1x32xf32> to vector<96x32xf32>
    %63 = arith.addf %51, %62 : vector<96x32xf32>
    %c1_66 = arith.constant 1 : index
    %c0_67 = arith.constant 0 : index
    %c0_68 = arith.constant 0 : index
    %64 = vector.load %arg4[%c1_66, %c0_67, %c0_68] : memref<3x1x32xf32, #tpu.memory_space<vmem>>, vector<1x1x32xf32>
    %65 = vector.shape_cast %64 : vector<1x1x32xf32> to vector<1x32xf32>
    %66 = vector.broadcast %65 : vector<1x32xf32> to vector<96x32xf32>
    %67 = arith.addf %55, %66 : vector<96x32xf32>
    %c2_69 = arith.constant 2 : index
    %c0_70 = arith.constant 0 : index
    %c0_71 = arith.constant 0 : index
    %68 = vector.load %arg4[%c2_69, %c0_70, %c0_71] : memref<3x1x32xf32, #tpu.memory_space<vmem>>, vector<1x1x32xf32>
    %69 = vector.shape_cast %68 : vector<1x1x32xf32> to vector<1x32xf32>
    %70 = vector.broadcast %69 : vector<1x32xf32> to vector<96x32xf32>
    %71 = arith.addf %59, %70 : vector<96x32xf32>
    %72 = arith.negf %67 : vector<96x32xf32>
    %73 = math.exp %72 : vector<96x32xf32>
    %cst_72 = arith.constant 1.000000e+00 : f32
    %74 = vector.broadcast %cst_72 : f32 to vector<96x32xf32>
    %75 = arith.addf %74, %73 : vector<96x32xf32>
    %76 = arith.divf %74, %75 : vector<96x32xf32>
    %77 = arith.addf %63, %76 : vector<96x32xf32>
    %78 = arith.addf %77, %71 : vector<96x32xf32>
    %cst_73 = arith.constant 0.000000e+00 : f32
    %79 = vector.broadcast %cst_73 : f32 to vector<96x32xf32>
    %80 = arith.maximumf %78, %79 : vector<96x32xf32>
    %c0_74 = arith.constant 0 : index
    %c0_75 = arith.constant 0 : index
    %81 = vector.load %arg5[%c0_74, %c0_75] : memref<96x32xf32, #tpu.memory_space<vmem>>, vector<96x32xf32>
    tpu.vector_store %arg5[%c0_74, %c0_75], %80 {strides = array<i32>} : memref<96x32xf32, #tpu.memory_space<vmem>>, vector<96x32xf32>,
    return
  }
  func.func @transform_1(%arg0: i32, %arg1: i32) -> (i32, i32, i32, i32) {
    %c0_i32 = arith.constant 0 : i32
    %c0_i32_0 = arith.constant 0 : i32
    %c0_i32_1 = arith.constant 0 : i32
    %c0_i32_2 = arith.constant 0 : i32
    %c0_i32_3 = arith.constant 0 : i32
    return %c0_i32, %c0_i32_0, %c0_i32_1, %c0_i32_2 : i32, i32, i32, i32
  }
  func.func @transform_2(%arg0: i32, %arg1: i32) -> (i32, i32, i32) {
    %c0_i32 = arith.constant 0 : i32
    %c0_i32_0 = arith.constant 0 : i32
    %c0_i32_1 = arith.constant 0 : i32
    %c0_i32_2 = arith.constant 0 : i32
    return %c0_i32, %c0_i32_0, %c0_i32_1 : i32, i32, i32
  }
  func.func @transform_3(%arg0: i32, %arg1: i32) -> (i32, i32) {
    %c1_i32 = arith.constant 1 : i32
    %0 = arith.muli %arg0, %c1_i32 : i32
    %1 = arith.addi %0, %arg1 : i32
    %c0_i32 = arith.constant 0 : i32
    %c0_i32_0 = arith.constant 0 : i32
    return %1, %c0_i32 : i32, i32
  }
}

</mosaic_0001>

<bundles_post_ra>
// kernel: tpu_custom_call.1
= control target key start
LH: loop header
LB: loop body
LE: loop exit
PB: predicated region body
PF: predicated region fallthrough
CT: control target
= control target key end

     0   :  { %s2475_s12 = smov 0   ;;  %s2477_s13 = smov 0   ;;  %s2925_s0 = inlined_call_operand.vmem [shape: f32[256,4], index: 0, kind: input, shape index: {}]   ;;  %s2926_s1 = inlined_call_operand.vmem [shape: f32[3,3,4,32], index: 1, kind: input, shape index: {}]   ;;  %s2927_s2 = inlined_call_operand.vmem [shape: f32[3,1,32], index: 2, kind: input, shape index: {}]   ;;  %s2928_s3 = inlined_call_operand.vmem [shape: f32[192,32], index: 3, kind: output, shape index: {}]  }
   0x1   :  { %s2479_s14 = smov 0  }
   0x2 LB: > { %s25_s15 = sadd.s32 1, %s2449_s13  ;;  %p1790_p0 = scmp.ge.s32.totalorder %s2453_s14, 1  ;;  %s2453_s14 = sphi %s2479_s14, %s13_s14   ;;  %s2449_s13 = sphi %s2477_s13, %s2930_s13   ;;  %s2445_s12 = sphi %s2475_s12, %s2929_s12  }
   0x3   : > { %p27_p1 = scmp.ge.s32.totalorder %s25_s15, 2  ;;  %p117_p2 = scmp.lt.s32.totalorder %s2453_s14, 3 }
   0x5   : > { %s2932_s15 = smov (%p27_p1, %s25_s15), 0  ;;  %p118_p3 = pnand %p1790_p0, %p117_p2 }
   0x6   : > { %s136_s16 = smul.u32 (!%p118_p3), 12, %s2445_s12  ;;  %s1792_s17 = sshll.u32 (!%p118_p3), %s2445_s12, 7 }
   0x7   : > { %121 = sbr.rel (%p118_p3) target bundleno = 375 (0x177), region = 28  ;;  %s148_s20 = scalar_lea.vmem (!%p118_p3), %s2925_s0, %s1792_s17 }
   0x8   : > { %p137_p4 = scmp.lt.s32.totalorder (!%p118_p3), %s136_s16, 23  ;;  %v2496_v0 = vld [vmem:[%s148_s20] sm:$0xff] (!%p118_p3)  ;;  %v2498_v1 = vld [vmem:[%s148_s20 + $0x8] sm:$0xff] (!%p118_p3)  ;;  %v2500_v2 = vld [vmem:[%s148_s20 + $0x10] sm:$0xff] (!%p118_p3) }
   0x9   : > { %v2502_v3 = vld [vmem:[%s148_s20 + $0x18] sm:$0xff] (!%p118_p3)  ;;  %v2504_v4 = vld [vmem:[%s148_s20 + $0x20] sm:$0xff] (!%p118_p3)  ;;  %v2506_v5 = vld [vmem:[%s148_s20 + $0x28] sm:$0xff] (!%p118_p3) }
   0xa   : > { %v2508_v6 = vld [vmem:[%s148_s20 + $0x30] sm:$0xff] (!%p118_p3)  ;;  %v2510_v7 = vld [vmem:[%s148_s20 + $0x38] sm:$0xff] (!%p118_p3)  ;;  %v2512_v8 = vld [vmem:[%s148_s20 + $0x40] sm:$0xff] (!%p118_p3) }
   0xb   : > { %v2514_v9 = vld [vmem:[%s148_s20 + $0x48] sm:$0xff] (!%p118_p3)  ;;  %v2516_v10 = vld [vmem:[%s148_s20 + $0x50] sm:$0xff] (!%p118_p3)  ;;  %v2518_v11 = vld [vmem:[%s148_s20 + $0x58] sm:$0xff] (!%p118_p3) }
   0xc   : > { %v2520_v12 = vld [vmem:[%s148_s20 + $0x60] sm:$0xff] (!%p118_p3)  ;;  %v2522_v13 = vld [vmem:[%s148_s20 + $0x68] sm:$0xff] (!%p118_p3)  ;;  %v2524_v14 = vld [vmem:[%s148_s20 + $0x70] sm:$0xff] (!%p118_p3) }
   0xd   : > { %v2531_v15 = vld [vmem:[%s148_s20 + $0x78] sm:$0xff] (!%p118_p3) }
   0xe   : > { %s2934_s16 = smov (!%p137_p4, %s136_s16), 23 }
   0xf   : > { %s1791_s21 = sshll.u32 %s2934_s16, 3 }
  0x10   : > { %s2529_s24 = scalar_lea.vmem %s2928_s3, %s1791_s21 }
  0x11   : > { %220 = vsyncadd [#allocation3], 2048 }
  0x12   : > { %2441 = dma.done.wait [#allocation3], 2048 }
  0x13   : > { %2442 = vsyncadd [#allocation3], 4294965248  ;;  %vm245_vm0 = vcmask 31744   ;;  %vm282_vm1 = vcmask 1043456   ;;  %v1795_v16 = vld [vmem:[%s2926_s1 + $0x4] sm:$0xf] }
  0x14   : > { %2057 = vmatprep.mubr.msk.f32.mxu1 %vm245_vm0, %v2500_v2  ;;  %2077 = vmatprep.mubr.msk.f32.mxu0 %vm245_vm0, %v2496_v0  ;;  %v236_v17 = vld [vmem:[%s2926_s1] sm:$0xf]  ;;  %v1849_v18 = vld [vmem:[%s2926_s1 + $0x1c] sm:$0xf]  ;;  %v1822_v19 = vld [vmem:[%s2926_s1 + $0x10] sm:$0xf] }
  0x15   : > { %2055 = vmatprep.subr.msk.mxu1 %vm282_vm1, %v1795_v16  ;;  %2075 = vmatprep.subr.msk.mxu0 %vm282_vm1, %v236_v17  ;;  %v1794_v20 = vld [vmem:[%s2926_s1 + $0x18] sm:$0xf]  ;;  %v1876_v21 = vld [vmem:[%s2926_s1 + $0x8] sm:$0xf]  ;;  %v1793_v22 = vld [vmem:[%s2926_s1 + $0xc] sm:$0xf] }
  0x16   : > { %2056 = vmatpush3.msk.msra.mxu1 %vm282_vm1, %v1795_v16  ;;  %2076 = vmatpush3.msk.msra.mxu0 %vm282_vm1, %v236_v17  ;;  %v1890_v23 = vld [vmem:[%s2926_s1 + $0x14] sm:$0xf]  ;;  %v1904_v24 = vld [vmem:[%s2926_s1 + $0x20] sm:$0xf]  ;;  %vm1702_vm2 = vcmask 261120  }
  0x17   : > { %2058 = vmatmul.mubr.msk.f32.vlgmr.msra.gmra.mrb[0].mxu1 %vm245_vm0, %v2502_v3  ;;  %2235 = vmatprep.subr.msk.mxu1 %vm282_vm1, %v236_v17  ;;  %v2805_v37 = vld [vmem:[%s2927_s2 + $0x1] ss:$0 sm:$0xff] }
  0x18   : > { %2078 = vmatmul.mubr.msk.f32.vlgmr.msra.gmra.mrb[0].mxu0 %vm245_vm0, %v2498_v1  ;;  %2236 = vmatpush3.msk.msra.mxu1 %vm282_vm1, %v236_v17 }
  0x19   : > { %2060 = vmatprep.mubr.msk.f32.mxu1 %vm245_vm0, %v2504_v4  ;;  %2080 = vmatprep.mubr.msk.f32.mxu0 %vm245_vm0, %v2500_v2 }
  0x1a   : > { %2135 = vmatprep.subr.msk.mxu0 %vm282_vm1, %v1849_v18  ;;  %2095 = vmatprep.subr.msk.mxu1 %vm282_vm1, %v1822_v19 }
  0x1b   : > { %2061 = vmatmul.mubr.msk.f32.gmra.mrb[2].mxu1 %vm245_vm0, %v2506_v5  ;;  %2136 = vmatpush3.msk.msra.mxu0 %vm282_vm1, %v1849_v18 }
  0x1c   : > { %2081 = vmatmul.mubr.msk.f32.gmra.mrb[2].mxu0 %vm245_vm0, %v2502_v3  ;;  %2063 = vmatprep.mubr.msk.f32.mxu1 %vm245_vm0, %v2508_v6 }
  0x1d   : > { %2083 = vmatprep.mubr.msk.f32.mxu0 %vm245_vm0, %v2504_v4  ;;  %2155 = vmatprep.subr.msk.mxu0 %vm282_vm1, %v1794_v20 }
  0x1f   : > { %2064 = vmatmul.mubr.msk.f32.gmra.mrb[4].mxu1 %vm245_vm0, %v2510_v7 }
  0x20   : > { %2084 = vmatmul.mubr.msk.f32.gmra.mrb[4].mxu0 %vm245_vm0, %v2506_v5  ;;  %2066 = vmatprep.mubr.msk.f32.mxu1 %vm245_vm0, %v2512_v8 }
  0x21   : > { %2137 = vmatprep.mubr.msk.f32.mxu0 %vm245_vm0, %v2500_v2 }
  0x23   : > { %2067 = vmatmul.mubr.msk.f32.gmra.mrb[6].mxu1 %vm245_vm0, %v2514_v9 }
  0x24   : > { %2138 = vmatmul.mubr.msk.f32.vlgmr.msra.gmra.mrb[0].mxu0 %vm245_vm0, %v2502_v3  ;;  %2069 = vmatprep.mubr.msk.f32.mxu1 %vm245_vm0, %v2516_v10 }
  0x25   : > { %2140 = vmatprep.mubr.msk.f32.mxu0 %vm245_vm0, %v2504_v4  ;;  %2156 = vmatpush3.msk.msra.mxu0 %vm282_vm1, %v1794_v20 }
  0x26   : > { %2175 = vmatprep.subr.msk.mxu0 %vm282_vm1, %v1876_v21 }
  0x27   : > { %2070 = vmatmul.mubr.msk.f32.gmra.mrb[8].mxu1 %vm245_vm0, %v2518_v11 }
  0x28   : > { %2141 = vmatmul.mubr.msk.f32.gmra.mrb[2].mxu0 %vm245_vm0, %v2506_v5  ;;  %2072 = vmatprep.mubr.msk.f32.mxu1 %vm245_vm0, %v2520_v12 }
  0x29   : > { %2143 = vmatprep.mubr.msk.f32.mxu0 %vm245_vm0, %v2508_v6 }
  0x2b   : > { %2073 = vmatmul.mubr.msk.f32.gmra.mrb[10].mxu1 %vm245_vm0, %v2522_v13 }
  0x2c   : > { %2144 = vmatmul.mubr.msk.f32.gmra.mrb[4].mxu0 %vm245_vm0, %v2510_v7  ;;  %2086 = vmatprep.mubr.msk.f32.mxu1 %vm245_vm0, %v2508_v6 }
  0x2d   : > { %2146 = vmatprep.mubr.msk.f32.mxu0 %vm245_vm0, %v2512_v8 }
  0x2f   : > { %2087 = vmatmul.mubr.msk.f32.vlgmr.msra.gmra.mrb[6].mxu1 %vm245_vm0, %v2510_v7 }
  0x30   : > { %2147 = vmatmul.mubr.msk.f32.gmra.mrb[6].mxu0 %vm245_vm0, %v2514_v9  ;;  %2096 = vmatpush3.msk.msra.mxu1 %vm282_vm1, %v1822_v19 }
  0x31   : > { %2089 = vmatprep.mubr.msk.f32.mxu1 %vm245_vm0, %v2512_v8  ;;  %2149 = vmatprep.mubr.msk.f32.mxu0 %vm245_vm0, %v2516_v10 }
  0x32   : > { %2115 = vmatprep.subr.msk.mxu1 %vm282_vm1, %v1793_v22 }
  0x33   : > { %2090 = vmatmul.mubr.msk.f32.gmra.mrb[8].mxu1 %vm245_vm0, %v2514_v9 }
  0x34   : > { %2150 = vmatmul.mubr.msk.f32.gmra.mrb[8].mxu0 %vm245_vm0, %v2518_v11  ;;  %2092 = vmatprep.mubr.msk.f32.mxu1 %vm245_vm0, %v2516_v10 }
  0x35   : > { %2152 = vmatprep.mubr.msk.f32.mxu0 %vm245_vm0, %v2520_v12 }
  0x37   : > { %2093 = vmatmul.mubr.msk.f32.gmra.mrb[10].mxu1 %vm245_vm0, %v2518_v11 }
  0x38   : > { %2153 = vmatmul.mubr.msk.f32.gmra.mrb[10].mxu0 %vm245_vm0, %v2522_v13  ;;  %2097 = vmatprep.mubr.msk.f32.mxu1 %vm245_vm0, %v2500_v2 }
  0x39   : > { %2157 = vmatprep.mubr.msk.f32.mxu0 %vm245_vm0, %v2496_v0 }
  0x3b   : > { %2098 = vmatmul.mubr.msk.f32.vlgmr.msra.gmra.mrb[12].mxu1 %vm245_vm0, %v2502_v3 }
  0x3c   : > { %2158 = vmatmul.mubr.msk.f32.vlgmr.msra.gmra.mrb[0].mxu0 %vm245_vm0, %v2498_v1  ;;  %2116 = vmatpush3.msk.msra.mxu1 %vm282_vm1, %v1793_v22 }
  0x3d   : > { %2100 = vmatprep.mubr.msk.f32.mxu1 %vm245_vm0, %v2504_v4  ;;  %2160 = vmatprep.mubr.msk.f32.mxu0 %vm245_vm0, %v2500_v2 }
  0x3e   : > { %2176 = vmatpush3.msk.msra.mxu0 %vm282_vm1, %v1876_v21  ;;  %2195 = vmatprep.subr.msk.mxu1 %vm282_vm1, %v1890_v23 }
  0x3f   : > { %2101 = vmatmul.mubr.msk.f32.gmra.mrb[14].mxu1 %vm245_vm0, %v2506_v5  ;;  %2215 = vmatprep.subr.msk.mxu0 %vm282_vm1, %v1904_v24 }
  0x40   : > { %2161 = vmatmul.mubr.msk.f32.gmra.mrb[2].mxu0 %vm245_vm0, %v2502_v3  ;;  %2103 = vmatprep.mubr.msk.f32.mxu1 %vm245_vm0, %v2508_v6 }
  0x41   : > { %2163 = vmatprep.mubr.msk.f32.mxu0 %vm245_vm0, %v2504_v4 }
  0x43   : > { %2104 = vmatmul.mubr.msk.f32.gmra.mrb[16].mxu1 %vm245_vm0, %v2510_v7 }
  0x44   : > { %2164 = vmatmul.mubr.msk.f32.gmra.mrb[4].mxu0 %vm245_vm0, %v2506_v5  ;;  %2106 = vmatprep.mubr.msk.f32.mxu1 %vm245_vm0, %v2512_v8 }
  0x45   : > { %2166 = vmatprep.mubr.msk.f32.mxu0 %vm245_vm0, %v2508_v6 }
  0x47   : > { %2107 = vmatmul.mubr.msk.f32.gmra.mrb[18].mxu1 %vm245_vm0, %v2514_v9 }
  0x48   : > { %2167 = vmatmul.mubr.msk.f32.gmra.mrb[6].mxu0 %vm245_vm0, %v2510_v7  ;;  %2109 = vmatprep.mubr.msk.f32.mxu1 %vm245_vm0, %v2516_v10 }
  0x49   : > { %2169 = vmatprep.mubr.msk.f32.mxu0 %vm245_vm0, %v2512_v8 }
  0x4b   : > { %2110 = vmatmul.mubr.msk.f32.gmra.mrb[20].mxu1 %vm245_vm0, %v2518_v11 }
  0x4c   : > { %2170 = vmatmul.mubr.msk.f32.gmra.mrb[8].mxu0 %vm245_vm0, %v2514_v9  ;;  %2112 = vmatprep.mubr.msk.f32.mxu1 %vm245_vm0, %v2520_v12 }
  0x4d   : > { %2172 = vmatprep.mubr.msk.f32.mxu0 %vm245_vm0, %v2516_v10 }
  0x4f   : > { %2113 = vmatmul.mubr.msk.f32.gmra.mrb[22].mxu1 %vm245_vm0, %v2522_v13 }
  0x50   : > { %2173 = vmatmul.mubr.msk.f32.gmra.mrb[10].mxu0 %vm245_vm0, %v2518_v11  ;;  %2117 = vmatprep.mubr.msk.f32.mxu1 %vm245_vm0, %v2496_v0 }
  0x51   : > { %2177 = vmatprep.mubr.msk.f32.mxu0 %vm245_vm0, %v2504_v4 }
  0x53   : > { %2118 = vmatmul.mubr.msk.f32.vlgmr.msra.gmra.mrb[12].mxu1 %vm245_vm0, %v2498_v1 }
  0x54   : > { %2178 = vmatmul.mubr.msk.f32.vlgmr.msra.gmra.mrb[0].mxu0 %vm245_vm0, %v2506_v5  ;;  %2196 = vmatpush3.msk.msra.mxu1 %vm282_vm1, %v1890_v23 }
  0x55   : > { %2120 = vmatprep.mubr.msk.f32.mxu1 %vm245_vm0, %v2500_v2  ;;  %2180 = vmatprep.mubr.msk.f32.mxu0 %vm245_vm0, %v2508_v6 }
  0x56   : > { %2216 = vmatpush3.msk.msra.mxu0 %vm282_vm1, %v1904_v24 }
  0x57   : > { %2121 = vmatmul.mubr.msk.f32.gmra.mrb[14].mxu1 %vm245_vm0, %v2502_v3 }
  0x58   : > { %2181 = vmatmul.mubr.msk.f32.gmra.mrb[2].mxu0 %vm245_vm0, %v2510_v7  ;;  %2123 = vmatprep.mubr.msk.f32.mxu1 %vm245_vm0, %v2504_v4 }
  0x59   : > { %2183 = vmatprep.mubr.msk.f32.mxu0 %vm245_vm0, %v2512_v8 }
  0x5b   : > { %2124 = vmatmul.mubr.msk.f32.gmra.mrb[16].mxu1 %vm245_vm0, %v2506_v5 }
  0x5c   : > { %2184 = vmatmul.mubr.msk.f32.gmra.mrb[4].mxu0 %vm245_vm0, %v2514_v9  ;;  %2126 = vmatprep.mubr.msk.f32.mxu1 %vm245_vm0, %v2508_v6 }
  0x5d   : > { %2186 = vmatprep.mubr.msk.f32.mxu0 %vm245_vm0, %v2516_v10 }
  0x5f   : > { %2127 = vmatmul.mubr.msk.f32.gmra.mrb[18].mxu1 %vm245_vm0, %v2510_v7 }
  0x60   : > { %2187 = vmatmul.mubr.msk.f32.gmra.mrb[6].mxu0 %vm245_vm0, %v2518_v11  ;;  %2129 = vmatprep.mubr.msk.f32.mxu1 %vm245_vm0, %v2512_v8 }
  0x61   : > { %2189 = vmatprep.mubr.msk.f32.mxu0 %vm245_vm0, %v2520_v12 }
  0x63   : > { %2130 = vmatmul.mubr.msk.f32.gmra.mrb[20].mxu1 %vm245_vm0, %v2514_v9 }
  0x64   : > { %2190 = vmatmul.mubr.msk.f32.gmra.mrb[8].mxu0 %vm245_vm0, %v2522_v13  ;;  %2132 = vmatprep.mubr.msk.f32.mxu1 %vm245_vm0, %v2516_v10 }
  0x65   : > { %2192 = vmatprep.mubr.msk.f32.mxu0 %vm245_vm0, %v2524_v14 }
  0x67   : > { %2133 = vmatmul.mubr.msk.f32.gmra.mrb[22].mxu1 %vm245_vm0, %v2518_v11 }
  0x68   : > { %2193 = vmatmul.mubr.msk.f32.gmra.mrb[10].mxu0 %vm245_vm0, %v2531_v15  ;;  %2197 = vmatprep.mubr.msk.f32.mxu1 %vm245_vm0, %v2504_v4 }
  0x69   : > { %2217 = vmatprep.mubr.msk.f32.mxu0 %vm245_vm0, %v2504_v4 }
  0x6b   : > { %2198 = vmatmul.mubr.msk.f32.vlgmr.msra.gmra.mrb[12].mxu1 %vm245_vm0, %v2506_v5 }
  0x6c   : > { %2218 = vmatmul.mubr.msk.f32.vlgmr.msra.gmra.mrb[0].mxu0 %vm245_vm0, %v2506_v5  ;;  %2200 = vmatprep.mubr.msk.f32.mxu1 %vm245_vm0, %v2508_v6 }
  0x6d   : > { %2220 = vmatprep.mubr.msk.f32.mxu0 %vm245_vm0, %v2508_v6 }
  0x6f   : > { %2201 = vmatmul.mubr.msk.f32.gmra.mrb[14].mxu1 %vm245_vm0, %v2510_v7 }
  0x70   : > { %2221 = vmatmul.mubr.msk.f32.gmra.mrb[2].mxu0 %vm245_vm0, %v2510_v7  ;;  %2203 = vmatprep.mubr.msk.f32.mxu1 %vm245_vm0, %v2512_v8 }
  0x71   : > { %2223 = vmatprep.mubr.msk.f32.mxu0 %vm245_vm0, %v2512_v8 }
  0x73   : > { %2204 = vmatmul.mubr.msk.f32.gmra.mrb[16].mxu1 %vm245_vm0, %v2514_v9 }
  0x74   : > { %2224 = vmatmul.mubr.msk.f32.gmra.mrb[4].mxu0 %vm245_vm0, %v2514_v9  ;;  %2206 = vmatprep.mubr.msk.f32.mxu1 %vm245_vm0, %v2516_v10 }
  0x75   : > { %2226 = vmatprep.mubr.msk.f32.mxu0 %vm245_vm0, %v2516_v10 }
  0x77   : > { %2207 = vmatmul.mubr.msk.f32.gmra.mrb[18].mxu1 %vm245_vm0, %v2518_v11 }
  0x78   : > { %2227 = vmatmul.mubr.msk.f32.gmra.mrb[6].mxu0 %vm245_vm0, %v2518_v11  ;;  %2209 = vmatprep.mubr.msk.f32.mxu1 %vm245_vm0, %v2520_v12 }
  0x79   : > { %2229 = vmatprep.mubr.msk.f32.mxu0 %vm245_vm0, %v2520_v12 }
  0x7b   : > { %2210 = vmatmul.mubr.msk.f32.gmra.mrb[20].mxu1 %vm245_vm0, %v2522_v13 }
  0x7c   : > { %2230 = vmatmul.mubr.msk.f32.gmra.mrb[8].mxu0 %vm245_vm0, %v2522_v13  ;;  %2212 = vmatprep.mubr.msk.f32.mxu1 %vm245_vm0, %v2524_v14 }
  0x7d   : > { %2232 = vmatprep.mubr.msk.f32.mxu0 %vm245_vm0, %v2524_v14 }
  0x7f   : > { %2213 = vmatmul.mubr.msk.f32.gmra.mrb[22].mxu1 %vm245_vm0, %v2531_v15 }
  0x80   : > { %2233 = vmatmul.mubr.msk.f32.gmra.mrb[10].mxu0 %vm245_vm0, %v2531_v15 }
  0xea   : > { %v2059_v25 = vpop.f32.mrb[0].mxu1 }
  0xeb   : > { %v352_v26 = vpop.f32.mrb[1].mxu1 }
  0xee   : > { %v2062_v27 = vpop.f32.mrb[2].mxu1 }
  0xef   : > { %v362_v28 = vpop.f32.mrb[3].mxu1 }
  0xf2   : > { %v2065_v29 = vpop.f32.mrb[4].mxu1 }
  0xf3   : > { %v372_v30 = vpop.f32.mrb[5].mxu1 }
 0x102   : > { %v2088_v31 = vpop.f32.mrb[6].mxu1 }
 0x103   : > { %v516_v32 = vpop.f32.mrb[7].mxu1 }
 0x106   : > { %v2091_v33 = vpop.f32.mrb[8].mxu1 }
 0x107   : > { %v2796_v34 = vpop.f32.mrb[9].mxu1 }
 0x10a   : > { %v2798_v35 = vpop.f32.mrb[10].mxu1 }
 0x10b   : > { %v2800_v36 = vpop.f32.mrb[11].mxu1 }
 0x13e   : > { %v2199_v38 = vpop.f32.mrb[12].mxu1 }
 0x13f   : > { %v1563_v39 = vadd.f32 %v2199_v38, %v2805_v37  ;;  %v2219_v40 = vpop.f32.mrb[0].mxu0  ;;  %v1322_v41 = vpop.f32.mrb[13].mxu1 }
 0x140   : > { %v2808_v42 = vadd.f32 %v2219_v40, %v2059_v25  ;;  %v1562_v43 = vadd.f32 %v2805_v37, %v1322_v41  ;;  %v1464_v44 = vpop.f32.mrb[1].mxu0 }
 0x141   : > { %v1924_v45 = vmul.f32 -1.442695, %v1563_v39  ;;  %v2811_v46 = vadd.f32 %v1464_v44, %v352_v26 }
 0x142   : > { %v1923_v47 = vmul.f32 -1.442695, %v1562_v43  ;;  %v2202_v48 = vpop.f32.mrb[14].mxu1 }
 0x143   : > { %2381 = vpow2.f32 %v1924_v45  ;;  %v1565_v49 = vadd.f32 %v2202_v48, %v2805_v37  ;;  %v2222_v50 = vpop.f32.mrb[2].mxu0  ;;  %v1332_v51 = vpop.f32.mrb[15].mxu1 }
 0x144   : > { %2383 = vpow2.f32 %v1923_v47  ;;  %v2814_v52 = vadd.f32 %v2222_v50, %v2062_v27  ;;  %v1564_v53 = vadd.f32 %v2805_v37, %v1332_v51  ;;  %v1474_v54 = vpop.f32.mrb[3].mxu0  ;;  %v2856_v50 = vld [vmem:[%s2927_s2 + $0x2] ss:$0 sm:$0xff] }
 0x145   : > { %v1926_v55 = vmul.f32 -1.442695, %v1565_v49  ;;  %v2817_v56 = vadd.f32 %v1474_v54, %v362_v28 }
 0x146   : > { %v1925_v57 = vmul.f32 -1.442695, %v1564_v53  ;;  %v2205_v58 = vpop.f32.mrb[16].mxu1 }
 0x147   : > { %2385 = vpow2.f32 %v1926_v55  ;;  %v1567_v59 = vadd.f32 %v2205_v58, %v2805_v37  ;;  %v2225_v60 = vpop.f32.mrb[4].mxu0  ;;  %v1342_v61 = vpop.f32.mrb[17].mxu1 }
 0x148   : > { %2387 = vpow2.f32 %v1925_v57  ;;  %v2820_v62 = vadd.f32 %v2225_v60, %v2065_v29  ;;  %v1566_v63 = vadd.f32 %v2805_v37, %v1342_v61  ;;  %v1484_v0 = vpop.f32.mrb[5].mxu0  ;;  %v2841_v29 = vld [vmem:[%s2927_s2] ss:$0 sm:$0xff] }
 0x149   : > { %v1928_v1 = vmul.f32 -1.442695, %v1567_v59  ;;  %v2823_v2 = vadd.f32 %v1484_v0, %v372_v30  ;;  %v2238_v45 = vadd.f32 %v2808_v42, %v2841_v29  ;;  %v2250_v58 = vadd.f32 %v2817_v56, %v2841_v29 }
 0x14a   : > { %v1927_v3 = vmul.f32 -1.442695, %v1566_v63  ;;  %v2208_v4 = vpop.f32.mrb[18].mxu1 }
 0x14b   : > { %2389 = vpow2.f32 %v1928_v1  ;;  %v1569_v5 = vadd.f32 %v2208_v4, %v2805_v37  ;;  %v2228_v6 = vpop.f32.mrb[6].mxu0  ;;  %v1352_v7 = vpop.f32.mrb[19].mxu1  ;;  %v2239_v54 = vadd.f32 %v2238_v45, %v2856_v50 }
 0x14c   : > { %2391 = vpow2.f32 %v1927_v3  ;;  %v2826_v8 = vadd.f32 %v2228_v6, %v2088_v31  ;;  %v1568_v9 = vadd.f32 %v2805_v37, %v1352_v7  ;;  %v1494_v10 = vpop.f32.mrb[7].mxu0  ;;  %v2254_v3 = vadd.f32 %v2820_v62, %v2841_v29 }
 0x14d   : > { %v2382_v11 = vpop.eup %2381  ;;  %v1930_v12 = vmul.f32 -1.442695, %v1569_v5  ;;  %v2829_v13 = vadd.f32 %v1494_v10, %v516_v32  ;;  %v2251_v6 = vadd.f32 %v2250_v58, %v2856_v50  ;;  %v2258_v7 = vadd.f32 %v2823_v2, %v2841_v29 }
 0x14e   : > { %v2384_v14 = vpop.eup %2383  ;;  %v1631_v15 = vadd.f32 1.0, %v2382_v11  ;;  %v1929_v16 = vmul.f32 -1.442695, %v1568_v9  ;;  %v2211_v17 = vpop.f32.mrb[20].mxu1  ;;  %v2262_v2 = vadd.f32 %v2826_v8, %v2841_v29 }
 0x14f   : > { %v1630_v18 = vadd.f32 1.0, %v2384_v14  ;;  %2393 = vpow2.f32 %v1930_v12  ;;  %v1571_v19 = vadd.f32 %v2211_v17, %v2805_v37  ;;  %v2231_v20 = vpop.f32.mrb[8].mxu0  ;;  %v1362_v21 = vpop.f32.mrb[21].mxu1  ;;  %v2266_v8 = vadd.f32 %v2829_v13, %v2841_v29 }
 0x150   : > { %2395 = vrcp.f32 %v1631_v15  ;;  %v2832_v22 = vadd.f32 %v2231_v20, %v2091_v33  ;;  %v1570_v23 = vadd.f32 %v2805_v37, %v1362_v21  ;;  %v1504_v24 = vpop.f32.mrb[9].mxu0  ;;  %v2259_v20 = vadd.f32 %v2258_v7, %v2856_v50 }
 0x151   : > { %v2386_v25 = vpop.eup %2385  ;;  %2397 = vrcp.f32 %v1630_v18  ;;  %v1932_v26 = vmul.f32 -1.442695, %v1571_v19  ;;  %v2836_v27 = vadd.f32 %v1504_v24, %v2796_v34 }
 0x152   : > { %v2388_v28 = vpop.eup %2387  ;;  %v1633_v30 = vadd.f32 1.0, %v2386_v25  ;;  %2399 = vpow2.f32 %v1929_v16  ;;  %v1931_v31 = vmul.f32 -1.442695, %v1570_v23  ;;  %v2214_v32 = vpop.f32.mrb[22].mxu1  ;;  %v2255_v16 = vadd.f32 %v2254_v3, %v2856_v50 }
 0x153   : > { %v1632_v33 = vadd.f32 1.0, %v2388_v28  ;;  %2401 = vpow2.f32 %v1932_v26  ;;  %v1573_v38 = vadd.f32 %v2214_v32, %v2805_v37  ;;  %v2234_v39 = vpop.f32.mrb[10].mxu0  ;;  %v1372_v40 = vpop.f32.mrb[23].mxu1  ;;  %v2274_v13 = vadd.f32 %v2836_v27, %v2841_v29 }
 0x154   : > { %2403 = vrcp.f32 %v1633_v30  ;;  %v2845_v34 = vadd.f32 %v2234_v39, %v2798_v35  ;;  %v1572_v41 = vadd.f32 %v2805_v37, %v1372_v40  ;;  %v1514_v43 = vpop.f32.mrb[11].mxu0  ;;  %v2242_v35 = vadd.f32 %v2811_v46, %v2841_v29 }
 0x155   : > { %v2390_v44 = vpop.eup %2389  ;;  %2405 = vrcp.f32 %v1632_v33  ;;  %v1934_v47 = vmul.f32 -1.442695, %v1573_v38  ;;  %v2851_v48 = vadd.f32 %v1514_v43, %v2800_v36  ;;  %v2246_v36 = vadd.f32 %v2814_v52, %v2841_v29 }
 0x156   : > { %v2392_v49 = vpop.eup %2391  ;;  %v1635_v37 = vadd.f32 1.0, %v2390_v44  ;;  %2407 = vpow2.f32 %v1931_v31  ;;  %v1933_v51 = vmul.f32 -1.442695, %v1572_v41  ;;  %v2243_v57 = vadd.f32 %v2242_v35, %v2856_v50 }
 0x157   : > { %v1634_v53 = vadd.f32 1.0, %v2392_v49  ;;  %2409 = vpow2.f32 %v1934_v47  ;;  %v2247_v52 = vadd.f32 %v2246_v36, %v2856_v50  ;;  %v2263_v30 = vadd.f32 %v2262_v2, %v2856_v50 }
 0x158   : > { %2411 = vrcp.f32 %v1635_v37  ;;  %v2270_v31 = vadd.f32 %v2832_v22, %v2841_v29  ;;  %v2267_v40 = vadd.f32 %v2266_v8, %v2856_v50  ;;  %v2278_v44 = vadd.f32 %v2845_v34, %v2841_v29 }
 0x159   : > { %v2394_v42 = vpop.eup %2393  ;;  %2413 = vrcp.f32 %v1634_v53  ;;  %v2275_v37 = vadd.f32 %v2274_v13, %v2856_v50  ;;  %v2282_v27 = vadd.f32 %v2851_v48, %v2841_v29 }
 0x15a   : > { %v2396_v55 = vpop.eup %2395  ;;  %v1637_v46 = vadd.f32 1.0, %v2394_v42  ;;  %2415 = vpow2.f32 %v1933_v51  ;;  %v2271_v22 = vadd.f32 %v2270_v31, %v2856_v50  ;;  %v2279_v42 = vadd.f32 %v2278_v44, %v2856_v50 }
 0x15b   : > { %v2398_v59 = vpop.eup %2397  ;;  %v2240_v60 = vadd.f32 %v2396_v55, %v2239_v54 }
 0x15c   : > { %v2400_v61 = vpop.eup %2399  ;;  %v2244_v63 = vadd.f32 %v2398_v59, %v2243_v57  ;;  %2417 = vrcp.f32 %v1637_v46  ;;  %v2283_v57 = vadd.f32 %v2282_v27, %v2856_v50 }
 0x15d   : > { %v2402_v0 = vpop.eup %2401  ;;  %v1691_v1 = vmax.f32 %v2240_v60, 0.0  ;;  %v1636_v4 = vadd.f32 1.0, %v2400_v61 }
 0x15e   : > { %v2404_v5 = vpop.eup %2403  ;;  %v1690_v56 = vmax.f32 %v2244_v63, 0.0  ;;  %v1639_v9 = vadd.f32 1.0, %v2402_v0 }
 0x15f   : > { %v2406_v10 = vpop.eup %2405  ;;  %1704 = vst.msk [vmem:[%s2529_s24 + $0x8] sm:$0xff] %vm1702_vm2, %v1691_v1  ;;  %v2248_v11 = vadd.f32 %v2404_v5, %v2247_v52  ;;  %2419 = vrcp.f32 %v1636_v4 }
 0x160   : > { %v2408_v12 = vpop.eup %2407  ;;  %1703 = vst.msk [vmem:[%s2529_s24] sm:$0xff] %vm1702_vm2, %v1690_v56  ;;  %v2252_v14 = vadd.f32 %v2406_v10, %v2251_v6  ;;  %2421 = vrcp.f32 %v1639_v9 }
 0x161   : > { %v2410_v62 = vpop.eup %2409  ;;  %v1693_v15 = vmax.f32 %v2248_v11, 0.0  ;;  %v1638_v17 = vadd.f32 1.0, %v2408_v12 }
 0x162   : > { %v2412_v18 = vpop.eup %2411  ;;  %v1692_v19 = vmax.f32 %v2252_v14, 0.0  ;;  %v1641_v21 = vadd.f32 1.0, %v2410_v62 }
 0x163   : > { %v2414_v23 = vpop.eup %2413  ;;  %1706 = vst.msk [vmem:[%s2529_s24 + $0x18] sm:$0xff] %vm1702_vm2, %v1693_v15  ;;  %v2256_v24 = vadd.f32 %v2412_v18, %v2255_v16  ;;  %2423 = vrcp.f32 %v1638_v17 }
 0x164   : > { %v2416_v25 = vpop.eup %2415  ;;  %1705 = vst.msk [vmem:[%s2529_s24 + $0x10] sm:$0xff] %vm1702_vm2, %v1692_v19  ;;  %v2260_v26 = vadd.f32 %v2414_v23, %v2259_v20  ;;  %2425 = vrcp.f32 %v1641_v21 }
 0x165   : > { %v1695_v28 = vmax.f32 %v2256_v24, 0.0  ;;  %v1640_v32 = vadd.f32 1.0, %v2416_v25 }
 0x166   : > { %v2418_v33 = vpop.eup %2417  ;;  %v1694_v38 = vmax.f32 %v2260_v26, 0.0 }
 0x167   : > { %1708 = vst.msk [vmem:[%s2529_s24 + $0x28] sm:$0xff] %vm1702_vm2, %v1695_v28  ;;  %v2264_v39 = vadd.f32 %v2418_v33, %v2263_v30  ;;  %2427 = vrcp.f32 %v1640_v32 }
 0x168   : > { %1707 = vst.msk [vmem:[%s2529_s24 + $0x20] sm:$0xff] %vm1702_vm2, %v1694_v38 }
 0x169   : > { %v2420_v41 = vpop.eup %2419  ;;  %v1697_v43 = vmax.f32 %v2264_v39, 0.0 }
 0x16a   : > { %v2422_v45 = vpop.eup %2421  ;;  %v2268_v47 = vadd.f32 %v2420_v41, %v2267_v40 }
 0x16b   : > { %1710 = vst.msk [vmem:[%s2529_s24 + $0x38] sm:$0xff] %vm1702_vm2, %v1697_v43  ;;  %v2272_v49 = vadd.f32 %v2422_v45, %v2271_v22 }
 0x16c   : > { %v1696_v35 = vmax.f32 %v2268_v47, 0.0 }
 0x16d   : > { %v2424_v51 = vpop.eup %2423  ;;  %v1699_v53 = vmax.f32 %v2272_v49, 0.0 }
 0x16e   : > { %v2426_v54 = vpop.eup %2425  ;;  %1709 = vst.msk [vmem:[%s2529_s24 + $0x30] sm:$0xff] %vm1702_vm2, %v1696_v35  ;;  %v2276_v34 = vadd.f32 %v2424_v51, %v2275_v37 }
 0x16f   : > { %1712 = vst.msk [vmem:[%s2529_s24 + $0x48] sm:$0xff] %vm1702_vm2, %v1699_v53  ;;  %v2280_v36 = vadd.f32 %v2426_v54, %v2279_v42 }
 0x170   : > { %v1698_v55 = vmax.f32 %v2276_v34, 0.0 }
 0x171   : > { %v2428_v58 = vpop.eup %2427  ;;  %v1701_v46 = vmax.f32 %v2280_v36, 0.0 }
 0x172   : > { %1711 = vst.msk [vmem:[%s2529_s24 + $0x40] sm:$0xff] %vm1702_vm2, %v1698_v55  ;;  %v2284_v29 = vadd.f32 %v2428_v58, %v2283_v57 }
 0x173   : > { %1714 = vst.msk [vmem:[%s2529_s24 + $0x58] sm:$0xff] %vm1702_vm2, %v1701_v46 }
 0x174   : > { %v1700_v48 = vmax.f32 %v2284_v29, 0.0 }
 0x176   : > { %1713 = vst.msk [vmem:[%s2529_s24 + $0x50] sm:$0xff] %vm1702_vm2, %v1700_v48 }
 0x177 PF: > { %s13_s14 = sadd.s32 1, %s2453_s14   ;;  %s2929_s12 = smov %s2449_s13 }
 0x178   : > { %p10_p5 = scmp.ge.s32.totalorder %s13_s14, 4   ;;  %s2930_s13 = smov %s2932_s15 }
 0x17a   :  { %12 = sbr.rel (!%p10_p5) target bundleno = 2 (0x2), region = 112 }
 0x181   :  { %1740 = vsyncmov [#allocation3] }
 0x184   :  { %s1741_s26 = vpop.sfrf %1740 }
 0x185   :  { %p1937_p6 = scmp.ne.s32.totalorder %s1741_s26, 0 }
 0x187   :  { %1745 = shalt.err (%p1937_p6)  }

</bundles_post_ra>
